<compile_context>
chip_gen: v7x
topology: tpu7x:2x2x1
jax: 0.10.0
libtpu: 0.0.40
codegen_flags: <defaults>
</compile_context>

<pallas_src>
import functools

import jax
import jax.numpy as jnp
from jax.experimental import pallas as pl
from jax.experimental.pallas import tpu as pltpu


def _rmsnorm_kernel(x_ref, g_ref, o_ref, *, scale, eps):
    x = x_ref[...].astype(jnp.float32)                        # (tr, D)
    g = g_ref[...].astype(jnp.float32)                        # (1, D)  (hoisted once)
    sq_sum = jnp.sum(x * x, axis=-1, keepdims=True)           # (tr, 1)
    norm = jnp.maximum(jnp.sqrt(sq_sum) * scale, eps)         # clamp(min=eps)
    inv = pl.reciprocal(norm, approx=False)                   # exact per-row 1/norm
    o_ref[...] = ((x * inv) * g).astype(o_ref.dtype)


def _round_up(n, m):
    return ((n + m - 1) // m) * m


def _choose_row_block(rows, dim):
    """Pick a row tile so the f32 working block is ~4 MiB, multiple of 8,
    and the grid keeps >= 2 steps when there is enough work (v7x: 2 TCs)."""
    target_f32_bytes = 4 << 20
    rb = max(8, target_f32_bytes // (dim * 4))
    rb = min(rb, rows)
    if rows > 8:
        rb = min(rb, pl.cdiv(rows, 2))
    rb = _round_up(max(rb, 1), 8)
    return int(rb)


def rmsnorm(x, g, eps=1e-8, row_block=None):
    """x: (..., dim), g: (dim,). Returns same shape/dtype as x."""
    dim = x.shape[-1]
    scale = dim ** (-0.5)
    orig_shape = x.shape
    x2d = x.reshape(-1, dim)
    rows = x2d.shape[0]
    g2d = g.reshape(1, dim)

    # TODO(synk): for D < 128, lane-pack multiple logical rows per vreg row to avoid
    # masked partial stores; current path keeps D as the full (lane) dim, which is
    # correct but underfills vregs for very small feature dims.

    if row_block is None:
        row_block = _choose_row_block(rows, dim)

    grid = (pl.cdiv(rows, row_block),)
    kernel = functools.partial(_rmsnorm_kernel, scale=scale, eps=eps)

    out = pl.pallas_call(
        kernel,
        out_shape=jax.ShapeDtypeStruct((rows, dim), x.dtype),
        grid_spec=pltpu.PrefetchScalarGridSpec(
            num_scalar_prefetch=0,
            grid=grid,
            in_specs=[
                pl.BlockSpec((row_block, dim), lambda i: (i, 0)),
                pl.BlockSpec((1, dim), lambda i: (0, 0)),
            ],
            out_specs=pl.BlockSpec((row_block, dim), lambda i: (i, 0)),
        ),
        compiler_params=pltpu.CompilerParams(
            dimension_semantics=("parallel",),
            # ~4 MiB f32 blocks + double-buffered in/out stays well under this;
            # 56 MiB is below v7x's 64 MiB physical VMEM and v5e/v6e's 128 MiB.
            vmem_limit_bytes=56 << 20,
        ),
    )(x2d, g2d)

    return out.reshape(orig_shape)


if __name__ == "__main__":
    key = jax.random.PRNGKey(0)
    batch, seq, hidden = 2, 8, 32
    x = jax.random.normal(key, (batch, seq, hidden), dtype=jnp.float32)
    # Parameter g initialized as in nn.Parameter(torch.ones(dim)).
    g = jnp.ones((hidden,), dtype=jnp.float32)

    y = rmsnorm(x, g, eps=1e-8)
    y = jax.block_until_ready(y)

    # Reference check in plain JAX (same math as the PyTorch forward).
    norm = jnp.linalg.norm(x, axis=-1, keepdims=True) * hidden ** (-0.5)
    y_ref = x / jnp.maximum(norm, 1e-8) * g
    assert jnp.allclose(y, y_ref, atol=1e-5, rtol=1e-5), "mismatch vs reference"

    print("KERNEL_OK")
</pallas_src>

<mosaic_0001>
module attributes {stable_mosaic.version = 11 : i64} {
  func.func @_rmsnorm_kernel(%arg0: i32, %arg1: memref<8x32xf32, #tpu.memory_space<vmem>>, %arg2: memref<1x32xf32, #tpu.memory_space<vmem>>, %arg3: memref<8x32xf32, #tpu.memory_space<vmem>>) attributes {dimension_semantics = [#tpu.dimension_semantics<parallel>], iteration_bounds = array<i64: 2>, scalar_prefetch = 0 : i64, scratch_operands = 0 : i64, tpu.core_type = #tpu.core_type<tc>, window_params = [{transform_indices = @transform_0, window_bounds = array<i64: 8, 32>}, {pipeline_mode = #tpu.pipeline_mode<synchronous>, transform_indices = @transform_1, window_bounds = array<i64: 1, 32>}, {transform_indices = @transform_2, window_bounds = array<i64: 8, 32>}]} {
    %c0 = arith.constant 0 : index
    %c0_0 = arith.constant 0 : index
    %0 = vector.load %arg1[%c0, %c0_0] : memref<8x32xf32, #tpu.memory_space<vmem>>, vector<8x32xf32>
    %c0_1 = arith.constant 0 : index
    %c0_2 = arith.constant 0 : index
    %1 = vector.load %arg2[%c0_1, %c0_2] : memref<1x32xf32, #tpu.memory_space<vmem>>, vector<1x32xf32>
    %2 = arith.mulf %0, %0 : vector<8x32xf32>
    %cst = arith.constant dense<0.000000e+00> : vector<8xf32>
    %3 = vector.multi_reduction <add>, %2, %cst [1] : vector<8x32xf32> to vector<8xf32>
    %4 = vector.shape_cast %3 : vector<8xf32> to vector<8x1xf32>
    %5 = math.sqrt %4 : vector<8x1xf32>
    %cst_3 = arith.constant 0.176776692 : f32
    %6 = vector.broadcast %cst_3 : f32 to vector<8x1xf32>
    %7 = arith.mulf %5, %6 : vector<8x1xf32>
    %cst_4 = arith.constant 9.99999993E-9 : f32
    %8 = vector.broadcast %cst_4 : f32 to vector<8x1xf32>
    %9 = arith.maximumf %7, %8 : vector<8x1xf32>
    %10 = tpu.reciprocal %9 : vector<8x1xf32> -> vector<8x1xf32>
    %11 = vector.broadcast %10 : vector<8x1xf32> to vector<8x32xf32>
    %12 = arith.mulf %0, %11 : vector<8x32xf32>
    %13 = vector.broadcast %1 : vector<1x32xf32> to vector<8x32xf32>
    %14 = arith.mulf %12, %13 : vector<8x32xf32>
    %c0_5 = arith.constant 0 : index
    %c0_6 = arith.constant 0 : index
    %15 = vector.load %arg3[%c0_5, %c0_6] : memref<8x32xf32, #tpu.memory_space<vmem>>, vector<8x32xf32>
    tpu.vector_store %arg3[%c0_5, %c0_6], %14 {strides = array<i32>} : memref<8x32xf32, #tpu.memory_space<vmem>>, vector<8x32xf32>,
    return
  }
  func.func @transform_0(%arg0: i32) -> (i32, i32) {
    %c0_i32 = arith.constant 0 : i32
    %c0_i32_0 = arith.constant 0 : i32
    return %arg0, %c0_i32 : i32, i32
  }
  func.func @transform_1(%arg0: i32) -> (i32, i32) {
    %c0_i32 = arith.constant 0 : i32
    %c0_i32_0 = arith.constant 0 : i32
    %c0_i32_1 = arith.constant 0 : i32
    return %c0_i32, %c0_i32_0 : i32, i32
  }
  func.func @transform_2(%arg0: i32) -> (i32, i32) {
    %c0_i32 = arith.constant 0 : i32
    %c0_i32_0 = arith.constant 0 : i32
    return %arg0, %c0_i32 : i32, i32
  }
}

</mosaic_0001>

<bundles_post_ra>
// kernel: tpu_custom_call.1
= control target key start
LH: loop header
LB: loop body
LE: loop exit
PB: predicated region body
PF: predicated region fallthrough
CT: control target
= control target key end

     0   :  { %7 = vsyncpa [#allocation3], 0  ;;  %s613_s0 = inlined_call_operand.hbm [shape: f32[16,32], index: 0, kind: input, shape index: {}]   ;;  %s614_s1 = inlined_call_operand.vmem [shape: f32[1,32], index: 1, kind: input, shape index: {}]   ;;  %s615_s2 = inlined_call_operand.hbm [shape: f32[16,32], index: 2, kind: output, shape index: {}]  }
   0x1   :  { %9 = vsyncpa [#allocation3 + $0x1], 0 }
   0x2   :  { %10 = vsyncpa [#allocation4], 0 }
   0x3   :  { %12 = vsyncpa [#allocation4 + $0x1], 0  ;;  %s447_s9 = smov 0   ;;  %s449_s10 = smov 0  }
   0x4   :  { %s451_s11 = smov 0   ;;  %s453_s12 = smov 0  }
   0x5 LB: > { %s468_s13 = sadd.s32 4294967295, %s428_s12   ;;  %s269_s14 = sadd.s32 4294967294, %s428_s12   ;;  %s428_s12 = sphi %s453_s12, %s630_s12   ;;  %s424_s11 = sphi %s451_s11, %s629_s11   ;;  %s420_s10 = sphi %s449_s10, %s628_s10   ;;  %s416_s9 = sphi %s447_s9, %s627_s9  }
   0x6   : > { %s472_s15 = sadd.s32 1, %s428_s12   ;;  %s25_s16 = sadd.s32 1, %s424_s11 }
   0x7   : > { %s22_s17 = ssub.s32 %s428_s12, %s472_s15  ;;  %p32_p0 = scmp.ne.s32.totalorder %s424_s11, %s420_s10 }
   0x8   : > { %p23_p1 = scmp.eq.s32.totalorder %s22_s17, 0  ;;  %p33_p2 = scmp.eq.s32.totalorder %s428_s12, 0 }
   0x9   : > { %p38_p3 = scmp.ne.s32.totalorder %s420_s10, %s416_s9  ;;  %p39_p4 = scmp.eq.s32.totalorder %s468_s13, 0 }
   0xa   : > { %s484_s18 = scalar_select %p23_p1, %s424_s11, %s25_s16  }
   0xb   : > { %p486_p5 = por %p33_p2, %p32_p0  ;;  %p490_p6 = por %p39_p4, %p38_p3 }
   0xc   : > { %p83_p7 = scmp.eq.s32.totalorder %s468_s13, 1  ;;  %p89_p8 = scmp.eq.s32.totalorder %s269_s14, 1 }
   0xd   : > { %p294_p10 = scmp.lt.s32.totalorder %s428_s12, 2  ;;  %s112_s23 = sand.u32 1, %s424_s11  }
   0xe   : > { %p497_p11 = por %p83_p7, %p32_p0  ;;  %p501_p12 = por %p89_p8, %p38_p3 }
   0xf   : > { %s273_s24 = sshll.u32 %s428_s12, 7  ;;  %s272_s25 = sshll.u32 %s112_s23, 3 }
  0x10   : > { %s619_s21 = scalar_select %p497_p11, 1, 0 }
  0x11   : > { %s620_s22 = scalar_select %p501_p12, 1, 0 }
  0x12   : > { %s510_s28 = scalar_lea.hbm %s613_s0, %s273_s24  ;;  %s116_s29 = scalar_lea.vmem [#allocation2], %s272_s25 }
  0x13   : > { %s123_s30 = sshll.u32 %s116_s29, 4  ;;  %p514_p13 = pnand %p294_p10, %p486_p5  ;;  %s518_s30 = int_to_ptr.vmem [resolvable:$true] %s123_s30 }
  0x14   : > { %s113_s4 = scalar_lea.sflag [#allocation3], %s112_s23  ;;  %s332_s5 = scalar_lea.hbm %s510_s28, 128 }
  0x15   : > { %p333_p2 = scmp.ne.s32.totalorder %s510_s28, %s332_s5  ;;  %p334_p3 = pneg %p514_p13 }
  0x16   : > { %s337_s8 = scalar_lea.hbm %s613_s0, 256  ;;  %p338_p5 = scmp.lt.u32.totalorder %s510_s28, %s613_s0 }
  0x17   : > { %p335_p4 = pnand %p334_p3, %p333_p2  ;;  %p339_p8 = scmp.lt.u32.totalorder %s337_s8, %s332_s5 }
  0x18   : > { %p341_p9 = scmp.lt.u32.totalorder %s332_s5, %s510_s28 }
  0x19   : > { %p336_p7 = pneg %p335_p4  ;;  %p340_p10 = por %p339_p8, %p338_p5 }
  0x1b   : > { %p342_p0 = por %p341_p9, %p340_p10 }
  0x1d   : > { %p343_p1 = pnand %p342_p0, %p336_p7 }
  0x1f   : > { %346 = shalt.err (!%p343_p1)
}
  0x20   : > { %s347_s17 = scalar_lea.vmem %s518_s30, 128  ;;  %s430_s19 = smov [#allocation2]  }
  0x21   : > { %p348_p2 = scmp.ne.s32.totalorder %s518_s30, %s347_s17  ;;  %s352_s23 = sshll.u32 %s430_s19, 4  ;;  %s353_s23 = int_to_ptr.vmem [resolvable:$false] %s352_s23 }
  0x22   : > { %s354_s24 = scalar_lea.vmem %s353_s23, 256  ;;  %p355_p11 = scmp.lt.s32.totalorder %s518_s30, %s353_s23 }
  0x23   : > { %p350_p4 = pnand %p348_p2, %p334_p3  ;;  %p356_p5 = scmp.lt.s32.totalorder %s354_s24, %s347_s17 }
  0x25   : > { %p351_p12 = pneg %p350_p4  ;;  %p357_p8 = por %p356_p5, %p355_p11 }
  0x27   : > { %p358_p9 = pnand %p357_p8, %p351_p12 }
  0x29   : > { %361 = shalt.err (!%p358_p9)
}
  0x2a   : > { %289 = dma.hbm_to_vmem [thread:$0]  (!%p514_p13), %s510_s28, 128, %s518_s30, %s113_s4  }
  0x2b   : > { %p622_p0 = scmp.lt.s32.totalorder %s428_s12, 3  ;;  %p623_p1 = scmp.ge.s32.totalorder %s428_s12, 1 }
  0x2d   : > { %p129_p3 = pnand %p623_p1, %p622_p0 }
  0x2e   : > { %s552_s25 = sand.u32 (!%p129_p3), 1, %s420_s10  }
  0x2f   : > { %132 = sbr.rel (%p129_p3) target bundleno = 249 (0xf9), region = 28  ;;  %s275_s26 = sshll.u32 (!%p129_p3), %s552_s25, 3 }
  0x30   : > { %s135_s27 = scalar_lea.sflag (!%p129_p3), [#allocation3], %s552_s25  ;;  %s138_s29 = scalar_lea.vmem (!%p129_p3), [#allocation2], %s275_s26 }
  0x36   : > { %407 = dma.done.wait (%p490_p6), %s135_s27, 128  }
  0x37   : > { %409 = vsyncadd (%p490_p6), %s135_s27, 4294967168  ;;  %v159_v0 = vld [vmem:[%s138_s29] sm:$0xff]  ;;  %vm162_vm0 = vcmask 261120   ;;  %s279_s30 = sshll.u32 %s468_s13, 7  ;;  %s158_s3 = scalar_lea.vmem [#allocation5], %s275_s26 }
  0x38   : > { %v161_v1 = vmul.f32 %v159_v0, %v159_v0  ;;  %v277_v12 = vld [vmem:[%s614_s1] ss:$0 sm:$0xff]  ;;  %s199_s4 = sshll.u32 %s158_s3, 4  ;;  %s568_s7 = scalar_lea.hbm %s615_s2, %s279_s30  ;;  %s570_s4 = int_to_ptr.vmem [resolvable:$true] %s199_s4 }
  0x39   : > { %s186_s8 = scalar_lea.sflag [#allocation4], %s552_s25  ;;  %s362_s14 = scalar_lea.vmem %s570_s4, 128 }
  0x3a   : > { %v163_v2 = vsel %vm162_vm0, %v161_v1, 0.0  ;;  %p363_p6 = scmp.ne.s32.totalorder %s570_s4, %s362_s14  ;;  %p624_p11 = scmp.ne.s32.totalorder %s619_s21, 0 }
  0x3b   : > { %164 = vadd.xlane.f32.xlu0 %v163_v2  ;;  %s431_s13 = smov [#allocation5]  }
  0x3c   : > { %p364_p12 = pnand %p363_p6, %p624_p11  ;;  %s366_s16 = sshll.u32 %s431_s13, 4  ;;  %s367_s16 = int_to_ptr.vmem [resolvable:$false] %s366_s16 }
  0x3d   : > { %s368_s17 = scalar_lea.vmem %s367_s16, 256  ;;  %p369_p7 = scmp.lt.s32.totalorder %s570_s4, %s367_s16 }
  0x3e   : > { %p365_p13 = pneg %p364_p12  ;;  %p370_p10 = scmp.lt.s32.totalorder %s368_s17, %s362_s14 }
  0x40   : > { %p371_p2 = por %p370_p10, %p369_p7 }
  0x42   : > { %p372_p4 = pnand %p371_p2, %p365_p13 }
  0xc8   : > { %v165_v3 = vpop.xlane.xlu0 %164 }
  0xc9   : > { %328 = vrsqrt.f32 %v165_v3  ;;  %vm168_vm1 = vcmp.eq.f32.partialorder %v165_v3, inf  ;;  %v171_v6 = vand.u32 2147483648, %v165_v3  ;;  %vm170_vm2 = vcmp.eq.f32.partialorder %v165_v3, 0.0 }
  0xd3   : > { %v329_v4 = vpop.eup %328 }
  0xd4   : > { %v167_v5 = vmul.f32 %v329_v4, %v165_v3 }
  0xd6   : > { %v169_v7 = vsel %vm168_vm1, %v165_v3, %v167_v5 }
  0xd7   : > { %v172_v8 = vsel %vm170_vm2, %v171_v6, %v169_v7 }
  0xd8   : > { %v173_v9 = vmul.f32 0.17677669, %v172_v8 }
  0xda   : > { %v174_v10 = vmax.f32 %v173_v9, 1e-08 }
  0xdc   : > { %330 = vrcp.f32 %v174_v10 }
  0xe6   : > { %v331_v11 = vpop.eup %330 }
  0xe7   : > { %v176_v13 = vmul.f32 %v331_v11, %v159_v0 }
  0xe9   : > { %v183_v14 = vmul.f32 %v277_v12, %v176_v13 }
  0xeb   : > { %184 = vst.msk [vmem:[%s158_s3] sm:$0xff] %vm162_vm0, %v183_v14 }
  0xec   : > { %375 = shalt.err (!%p372_p4)
}
  0xed   : > { %s376_s19 = scalar_lea.hbm %s568_s7, 128  ;;  %s380_s25 = scalar_lea.hbm %s615_s2, 256 }
  0xee   : > { %p377_p5 = scmp.ne.s32.totalorder %s568_s7, %s376_s19  ;;  %p381_p0 = scmp.lt.u32.totalorder %s568_s7, %s615_s2 }
  0xef   : > { %p382_p1 = scmp.lt.u32.totalorder %s380_s25, %s376_s19  ;;  %p384_p6 = scmp.lt.u32.totalorder %s376_s19, %s568_s7 }
  0xf0   : > { %p378_p8 = pnand %p377_p5, %p624_p11 }
  0xf1   : > { %p383_p3 = por %p382_p1, %p381_p0 }
  0xf2   : > { %p379_p9 = pneg %p378_p8 }
  0xf3   : > { %p385_p12 = por %p384_p6, %p383_p3 }
  0xf5   : > { %p386_p13 = pnand %p385_p12, %p379_p9 }
  0xf7   : > { %389 = shalt.err (!%p386_p13)
}
  0xf8   : > { %284 = dma.vmem_to_hbm [thread:$0]  (%p624_p11), %s570_s4, 128, %s568_s7, %s186_s8  }
  0xf9 PF: > { %s211_s29 = sand.u32 1, %s416_s9   ;;  %p625_p7 = scmp.ne.s32.totalorder %s620_s22, 0 }
  0xfa   : > { %p626_p10 = scmp.ge.s32.totalorder %s428_s12, 2  ;;  %s212_s20 = scalar_lea.sflag [#allocation4], %s211_s29 }
  0xfc   : > { %p291_p2 = pnand %p626_p10, %p625_p7 }
  0xfe   : > { %411 = dma.done.wait (!%p291_p2), %s212_s20, 128  }
  0xff   : > { %413 = vsyncadd (!%p291_p2), %s212_s20, 4294967168  ;;  %p15_p4 = scmp.ge.s32.totalorder %s472_s15, 4   ;;  %s627_s9 = smov %s420_s10 }
 0x100   : > { %s628_s10 = smov %s424_s11  ;;  %s629_s11 = smov %s484_s18 }
 0x101   : > { %s630_s12 = smov %s472_s15  ;;  %17 = sbr.rel (!%p15_p4) target bundleno = 5 (0x5), region = 73 }
 0x108   :  { %217 = vsyncpa [#allocation3], 1 }
 0x109   :  { %219 = vsyncpa [#allocation3 + $0x1], 1 }
 0x10a   :  { %220 = vsyncpa [#allocation4], 1 }
 0x10b   :  { %222 = vsyncpa [#allocation4 + $0x1], 1 }

</bundles_post_ra>
